<compile_context>
chip_gen: v5e
topology: v5e:2x2
jax: 0.10.0
libtpu: 0.0.40
codegen_flags: <defaults>
</compile_context>

<pallas_src>
import functools
import math

import jax
import jax.numpy as jnp
from jax import lax
from jax.experimental import pallas as pl
from jax.experimental.pallas import tpu as pltpu

_LANE = 128
_SUBLANE = 8


def _lcm(a, b):
    return a * b // math.gcd(a, b)


def _as_supported(x):
    x = jnp.asarray(x)
    if x.dtype == jnp.float32 or x.dtype == jnp.bfloat16:
        return x
    return x.astype(jnp.float32)


def _pinball_kernel(pred_ref, target_ref, q_ref, out_ref, *,
                    tb, rows, mask_tail, fold):
    """One (tb, 128) lane-dense tile -> one (8, 128) per-block partial sum."""
    e = target_ref[...].astype(jnp.float32) - pred_ref[...].astype(jnp.float32)
    if mask_tail:
        # Ragged last block: rows >= `rows` hold garbage -> zero their error.
        rid = lax.broadcasted_iota(jnp.int32, e.shape, 0)
        e = jnp.where(pl.program_id(0) * tb + rid < rows, e, 0.0)
    # max((q-1)*e, q*e) == q*e + max(-e, 0): one mul + one max per element.
    losses = q_ref[...] * e + jnp.maximum(-e, 0.0)          # (tb, 128)
    if fold:
        # Fold sublanes in groups of 8 -> pure VPU adds, no cross-lane XLU.
        part = jnp.sum(losses.reshape(tb // _SUBLANE, _SUBLANE, _LANE), axis=0)
    else:
        # Tiny single-block path (tb not a multiple of 8): full sublane
        # reduce, result placed in row 0 of the (8,128) output block.
        s = jnp.sum(losses, axis=0, keepdims=True)           # (1, 128)
        rid8 = lax.broadcasted_iota(jnp.int32, (_SUBLANE, _LANE), 0)
        part = jnp.where(rid8 == 0, jnp.broadcast_to(s, (_SUBLANE, _LANE)), 0.0)
    out_ref[...] = part


def pinball_loss(pred, target, quantiles, *, block_rows=4096, buffering=2):
    """pred, target: (B, Q) float; quantiles: (Q,), (1, Q) or scalar. Scalar out."""
    pred = _as_supported(pred)
    target = _as_supported(target)
    assert pred.ndim == 2 and pred.shape == target.shape, (pred.shape, target.shape)
    B, Q = pred.shape

    qv = jnp.asarray(quantiles, jnp.float32).reshape(-1)
    if qv.shape[0] == 1 and Q > 1:
        qv = jnp.broadcast_to(qv, (Q,))
    assert qv.shape[0] == Q, (qv.shape, Q)

    # --- lane-dense flat view: (B, Q) row-major -> (rows, 128) ---------------
    N = B * Q
    pflat = pred.reshape(-1)
    tflat = target.reshape(-1)
    tail = (-N) % _LANE
    if tail:
        # <=127 zeros so the 128-lane view exists; zero pred==target==0 rows
        # contribute exactly 0 to the sum.
        pflat = jnp.pad(pflat, (0, tail))
        tflat = jnp.pad(tflat, (0, tail))
    rows = (N + tail) // _LANE
    p2 = pflat.reshape(rows, _LANE)
    t2 = tflat.reshape(rows, _LANE)

    # --- block-row choice -----------------------------------------------------
    # The quantile pattern repeats every `period` 128-lane rows; tb must be a
    # multiple of it (phase identical in every block) and of the sublane granule.
    granule = _SUBLANE if min(pred.dtype.itemsize, target.dtype.itemsize) >= 4 else 16
    period = Q // math.gcd(Q, _LANE)
    unit = _lcm(period, granule)
    cap_rows = (4 * 1024 * 1024) // (_LANE * 4)          # <= 4 MiB per f32 tile
    want = max(unit, min(int(block_rows), cap_rows))
    tb = unit * max(1, want // unit)
    if rows <= tb:
        tb = rows                                        # single block == full dims
    num_blocks = -(-rows // tb)
    mask_tail = (rows % tb) != 0
    fold = (tb % _SUBLANE) == 0

    # Resident quantile slab, one DMA total (constant index_map).
    reps = -(-(tb * _LANE) // Q)
    q_slab = jnp.tile(qv, reps)[: tb * _LANE].reshape(tb, _LANE)

    # --- pallas_call ----------------------------------------------------------
    data_kwargs = {}
    if buffering and buffering != 2:
        data_kwargs["pipeline_mode"] = pl.Buffered(int(buffering))
    in_specs = [
        pl.BlockSpec((tb, _LANE), lambda i: (i, 0), **data_kwargs),   # pred
        pl.BlockSpec((tb, _LANE), lambda i: (i, 0), **data_kwargs),   # target
        pl.BlockSpec((tb, _LANE), lambda i: (0, 0)),                  # quantile slab
    ]
    out_spec = pl.BlockSpec((_SUBLANE, _LANE), lambda i: (i, 0))

    kernel = functools.partial(_pinball_kernel, tb=tb, rows=rows,
                               mask_tail=mask_tail, fold=fold)
    partials = pl.pallas_call(
        kernel,
        out_shape=jax.ShapeDtypeStruct((num_blocks * _SUBLANE, _LANE), jnp.float32),
        grid_spec=pltpu.PrefetchScalarGridSpec(
            num_scalar_prefetch=0,
            grid=(num_blocks,),
            in_specs=in_specs,
            out_specs=out_spec,
        ),
        compiler_params=pltpu.CompilerParams(
            dimension_semantics=("parallel",),       # no cross-step state
            vmem_limit_bytes=32 * 1024 * 1024,
        ),
    )(p2, t2, q_slab)

    # Tiny final reduction + mean over batch in the wrapper (XLA tree-reduce).
    return jnp.sum(partials) / B


def _reference(pred, target, quantiles):
    error = target.astype(jnp.float32) - pred.astype(jnp.float32)
    q = jnp.asarray(quantiles, jnp.float32).reshape(1, -1)
    losses = jnp.maximum((q - 1.0) * error, q * error)
    return jnp.mean(jnp.sum(losses, axis=1))


if __name__ == "__main__":
    key = jax.random.PRNGKey(0)

    # Case 1: shapes implied by the module (B samples x Q quantile levels).
    B, Q = 8, 16
    k1, k2 = jax.random.split(key)
    pred = jax.random.normal(k1, (B, Q), dtype=jnp.float32)
    target = jax.random.normal(k2, (B, Q), dtype=jnp.float32)
    quantiles = jnp.linspace(1.0 / (Q + 1), Q / (Q + 1), Q, dtype=jnp.float32)
    loss = jax.block_until_ready(pinball_loss(pred, target, quantiles))
    ref = _reference(pred, target, quantiles)
    assert jnp.allclose(loss, ref, atol=1e-5, rtol=1e-5), (loss, ref)

    # Case 2: multi-block grid with a ragged, masked tail block.
    B2, Q2 = 300, 16
    k3, k4 = jax.random.split(k1)
    pred2 = jax.random.normal(k3, (B2, Q2), dtype=jnp.float32)
    target2 = jax.random.normal(k4, (B2, Q2), dtype=jnp.float32)
    q2 = jnp.linspace(0.05, 0.95, Q2, dtype=jnp.float32)
    loss2 = jax.block_until_ready(pinball_loss(pred2, target2, q2, block_rows=16))
    ref2 = _reference(pred2, target2, q2)
    assert jnp.allclose(loss2, ref2, atol=1e-4, rtol=1e-5), (loss2, ref2)

    # Case 3: Q does not divide 128 -> lcm-period lane-dense path, multi-block.
    B3, Q3 = 600, 10
    k5, k6 = jax.random.split(k2)
    pred3 = jax.random.normal(k5, (B3, Q3), dtype=jnp.float32)
    target3 = jax.random.normal(k6, (B3, Q3), dtype=jnp.float32)
    q3 = jnp.linspace(0.1, 0.9, Q3, dtype=jnp.float32)
    loss3 = jax.block_until_ready(pinball_loss(pred3, target3, q3, block_rows=40))
    ref3 = _reference(pred3, target3, q3)
    assert jnp.allclose(loss3, ref3, atol=1e-4, rtol=1e-4), (loss3, ref3)

    # Case 4: native bf16 inputs (streamed at 2 B/elem, upcast in-kernel).
    B4, Q4 = 64, 16
    k7, k8 = jax.random.split(k3)
    pred4 = jax.random.normal(k7, (B4, Q4), dtype=jnp.float32).astype(jnp.bfloat16)
    target4 = jax.random.normal(k8, (B4, Q4), dtype=jnp.float32).astype(jnp.bfloat16)
    q4 = jnp.linspace(0.05, 0.95, Q4, dtype=jnp.float32)
    loss4 = jax.block_until_ready(pinball_loss(pred4, target4, q4))
    ref4 = _reference(pred4, target4, q4)
    assert jnp.allclose(loss4, ref4, atol=1e-3, rtol=1e-3), (loss4, ref4)

    # Case 5: tiny single-block case where the row count is not a multiple of 8.
    B5, Q5 = 6, 10
    k9, k10 = jax.random.split(k4)
    pred5 = jax.random.normal(k9, (B5, Q5), dtype=jnp.float32)
    target5 = jax.random.normal(k10, (B5, Q5), dtype=jnp.float32)
    q5 = jnp.linspace(0.1, 0.9, Q5, dtype=jnp.float32)
    loss5 = jax.block_until_ready(pinball_loss(pred5, target5, q5))
    ref5 = _reference(pred5, target5, q5)
    assert jnp.allclose(loss5, ref5, atol=1e-5, rtol=1e-5), (loss5, ref5)

    print("KERNEL_OK")
</pallas_src>

<mosaic_0001>
module attributes {stable_mosaic.version = 11 : i64} {
  func.func @_pinball_kernel(%arg0: i32, %arg1: memref<1x128xf32, #tpu.memory_space<vmem>>, %arg2: memref<1x128xf32, #tpu.memory_space<vmem>>, %arg3: memref<1x128xf32, #tpu.memory_space<vmem>>, %arg4: memref<8x128xf32, #tpu.memory_space<vmem>>) attributes {dimension_semantics = [#tpu.dimension_semantics<parallel>], iteration_bounds = array<i64: 1>, scalar_prefetch = 0 : i64, scratch_operands = 0 : i64, tpu.core_type = #tpu.core_type<tc>, window_params = [{transform_indices = @transform_0, window_bounds = array<i64: 1, 128>}, {transform_indices = @transform_1, window_bounds = array<i64: 1, 128>}, {pipeline_mode = #tpu.pipeline_mode<synchronous>, transform_indices = @transform_2, window_bounds = array<i64: 1, 128>}, {transform_indices = @transform_3, window_bounds = array<i64: 8, 128>}]} {
    %c0 = arith.constant 0 : index
    %c0_0 = arith.constant 0 : index
    %0 = vector.load %arg2[%c0, %c0_0] : memref<1x128xf32, #tpu.memory_space<vmem>>, vector<1x128xf32>
    %c0_1 = arith.constant 0 : index
    %c0_2 = arith.constant 0 : index
    %1 = vector.load %arg1[%c0_1, %c0_2] : memref<1x128xf32, #tpu.memory_space<vmem>>, vector<1x128xf32>
    %2 = arith.subf %0, %1 : vector<1x128xf32>
    %c0_3 = arith.constant 0 : index
    %c0_4 = arith.constant 0 : index
    %3 = vector.load %arg3[%c0_3, %c0_4] : memref<1x128xf32, #tpu.memory_space<vmem>>, vector<1x128xf32>
    %4 = arith.mulf %3, %2 : vector<1x128xf32>
    %cst = arith.constant 0.000000e+00 : f32
    %5 = vector.broadcast %cst : f32 to vector<1x128xf32>
    %6 = arith.subf %5, %2 : vector<1x128xf32>
    %cst_5 = arith.constant 0.000000e+00 : f32
    %7 = vector.broadcast %cst_5 : f32 to vector<1x128xf32>
    %8 = arith.maximumf %6, %7 : vector<1x128xf32>
    %9 = arith.addf %4, %8 : vector<1x128xf32>
    %cst_6 = arith.constant dense<0.000000e+00> : vector<128xf32>
    %10 = vector.multi_reduction <add>, %9, %cst_6 [0] : vector<1x128xf32> to vector<128xf32>
    %11 = vector.shape_cast %10 : vector<128xf32> to vector<1x128xf32>
    %12 = tpu.iota {dimensions = array<i32: 0>} : vector<8x128xi32>
    %c0_i32 = arith.constant 0 : i32
    %13 = vector.broadcast %c0_i32 : i32 to vector<8x128xi32>
    %14 = arith.cmpi eq, %12, %13 : vector<8x128xi32>
    %15 = vector.shape_cast %11 : vector<1x128xf32> to vector<1x128xf32>
    %16 = vector.broadcast %15 : vector<1x128xf32> to vector<8x128xf32>
    %cst_7 = arith.constant 0.000000e+00 : f32
    %17 = vector.broadcast %cst_7 : f32 to vector<8x128xf32>
    %18 = arith.select %14, %16, %17 : vector<8x128xi1>, vector<8x128xf32>
    %c0_8 = arith.constant 0 : index
    %c0_9 = arith.constant 0 : index
    %19 = vector.load %arg4[%c0_8, %c0_9] : memref<8x128xf32, #tpu.memory_space<vmem>>, vector<8x128xf32>
    tpu.vector_store %arg4[%c0_8, %c0_9], %18 {strides = array<i32>} : memref<8x128xf32, #tpu.memory_space<vmem>>, vector<8x128xf32>,
    return
  }
  func.func @transform_0(%arg0: i32) -> (i32, i32) {
    %c0_i32 = arith.constant 0 : i32
    %c0_i32_0 = arith.constant 0 : i32
    return %arg0, %c0_i32 : i32, i32
  }
  func.func @transform_1(%arg0: i32) -> (i32, i32) {
    %c0_i32 = arith.constant 0 : i32
    %c0_i32_0 = arith.constant 0 : i32
    return %arg0, %c0_i32 : i32, i32
  }
  func.func @transform_2(%arg0: i32) -> (i32, i32) {
    %c0_i32 = arith.constant 0 : i32
    %c0_i32_0 = arith.constant 0 : i32
    %c0_i32_1 = arith.constant 0 : i32
    return %c0_i32, %c0_i32_0 : i32, i32
  }
  func.func @transform_3(%arg0: i32) -> (i32, i32) {
    %c0_i32 = arith.constant 0 : i32
    %c0_i32_0 = arith.constant 0 : i32
    return %arg0, %c0_i32 : i32, i32
  }
}

</mosaic_0001>

<bundles_post_ra>
// kernel: tpu_custom_call.1
= control target key start
LH: loop header
LB: loop body
LE: loop exit
PB: predicated region body
PF: predicated region fallthrough
CT: control target
= control target key end

     0   :  { %8 = vsyncpa [#allocation3], 0  ;;  %s194_s0 = inlined_call_operand.hbm [shape: f32[1,128], index: 0, kind: input, shape index: {}]   ;;  %s195_s1 = inlined_call_operand.hbm [shape: f32[1,128], index: 1, kind: input, shape index: {}]   ;;  %s196_s2 = inlined_call_operand.vmem [shape: f32[1,128], index: 2, kind: input, shape index: {}]   ;;  %s197_s3 = inlined_call_operand.hbm [shape: f32[8,128], index: 3, kind: output, shape index: {}]  }
   0x1   :  { %9 = vsyncpa [#allocation6], 0 }
   0x2   :  { %10 = vsyncpa [#allocation4], 0  ;;  %s16_s14 = sshll.u32 %s194_s0, 4  ;;  %s159_s15 = smov [#allocation2]   ;;  %s17_s14 = int_to_ptr.hbm [resolvable:$true] %s16_s14 }
   0x3   :  { %s18_s16 = sshll.u32 %s159_s15, 4  ;;  %s27_s19 = sshll.u32 %s195_s1, 4  ;;  %s19_s16 = int_to_ptr.vmem [resolvable:$true] %s18_s16  ;;  %s28_s19 = int_to_ptr.hbm [resolvable:$true] %s27_s19 }
   0x4   :  { %21 = dma.hbm_to_vmem [thread:$0]  %s17_s14, 16, %s19_s16, [#allocation3]  }
   0x5   :  { %s160_s20 = smov [#allocation5]  }
   0x6   :  { %s29_s21 = sshll.u32 %s160_s20, 4  ;;  %s30_s21 = int_to_ptr.vmem [resolvable:$true] %s29_s21 }
   0x7   :  { %32 = dma.hbm_to_vmem [thread:$0]  %s28_s19, 16, %s30_s21, [#allocation6]  }
   0x8   :  { %153 = dma.done.wait [#allocation3], 16  }
   0x9   :  { %154 = vsyncadd [#allocation3], 4294967280 }
   0xa   :  { %155 = dma.done.wait [#allocation6], 16  }
   0xb   :  { %156 = vsyncadd [#allocation6], 4294967280  ;;  %v43_v0 = vld [vmem:[#allocation5] sm:$0x1]  ;;  %v44_v1 = vld [vmem:[#allocation2] sm:$0x1]  ;;  %v52_v3 = vlaneseq }
   0xc   :  { %v46_v2 = vld [vmem:[%s196_s2] sm:$0x1]  ;;  %v45_v4 = vsub.f32 %v43_v0, %v44_v1  ;;  %s161_s1 = smov [#allocation7]   ;;  %s67_s26 = sshll.u32 %s197_s3, 4  ;;  %s68_s26 = int_to_ptr.hbm [resolvable:$true] %s67_s26 }
   0xd   :  { %v53_v7 = vshrl.u32 %v52_v3, 7  ;;  %s65_s23 = sshll.u32 %s161_s1, 4  ;;  %s66_s23 = int_to_ptr.vmem [resolvable:$true] %s65_s23 }
   0xe   :  { %v47_v5 = vmul.f32 %v46_v2, %v45_v4  ;;  %v48_v6 = vsub.f32 0.0, %v45_v4 }
   0xf   :  { %vm54_vm0 = vcmp.eq.s32.totalorder %v53_v7, 0 }
  0x10   :  { %v49_v8 = vmax.f32 %v48_v6, 0.0 }
  0x12   :  { %v50_v9 = vadd.f32 %v49_v8, %v47_v5 }
  0x14   :  { %v56_v10 = vperm.slane %v50_v9, 0 }
  0x16   :  { %v58_v11 = vsel %vm54_vm0, %v56_v10, 0.0 }
  0x17   :  { %59 = vst [vmem:[#allocation7] sm:$0xff] %v58_v11 }
  0x18   :  { %70 = dma.vmem_to_hbm [thread:$0]  %s66_s23, 128, %s68_s26, [#allocation4]  }
  0x19   :  { %157 = dma.done.wait [#allocation4], 128  }
  0x1a   :  { %158 = vsyncadd [#allocation4], 4294967168 }
  0x1b   :  { %75 = vsyncpa [#allocation3], 1 }
  0x1c   :  { %76 = vsyncpa [#allocation6], 1 }
  0x1d   :  { %77 = vsyncpa [#allocation4], 1 }

</bundles_post_ra>
